<compile_context>
chip_gen: v5e
topology: v5e:2x2
jax: 0.10.0
libtpu: 0.0.40
codegen_flags: <defaults>
</compile_context>

<pallas_src>
import jax
import jax.numpy as jnp
from jax.experimental import pallas as pl
from jax.experimental.pallas import tpu as pltpu


def _round_up(x, m):
    return ((x + m - 1) // m) * m


def _clip_mlp_kernel(x_ref, w1_ref, b1_ref, w2_ref, b2_ref, o_ref):
    # Cast the x tile to the MXU dtype in-kernel (hides under the matmul and
    # halves x-related HBM traffic vs. casting in the wrapper).
    x = x_ref[...].astype(w1_ref.dtype)

    # fc1: (tm, D) @ (D, I) -> (tm, I); bf16 operands, f32 result.
    h = jnp.dot(x, w1_ref[...], preferred_element_type=jnp.float32)
    h = h + b1_ref[...]                      # bias in f32
    h = h * jax.nn.sigmoid(1.702 * h)        # QuickGELU in f32 (EUP sigmoid)

    # fc2: (tm, I) @ (I, D) -> (tm, D); f32 result, then bias + cast + store.
    o = jnp.dot(h.astype(w2_ref.dtype), w2_ref[...],
                preferred_element_type=jnp.float32)
    o_ref[...] = (o + b2_ref[...]).astype(o_ref.dtype)


def prepare_clip_mlp_params(fc1_w, fc1_b, fc2_w, fc2_b,
                            *, compute_dtype=jnp.bfloat16):
    """One-time parameter prep (do at model init, NOT per forward call).

    Weights are expected in (in_features, out_features) layout, i.e. already
    transposed relative to nn.Linear.weight, so the kernel computes x @ W + b
    (numerically identical to x @ W.T + b with the PyTorch layout).
    """
    D, I = fc1_w.shape
    assert fc2_w.shape == (I, D)
    return {
        "w1": fc1_w.astype(compute_dtype),
        "b1": fc1_b.reshape(1, I).astype(jnp.float32),
        "w2": fc2_w.astype(compute_dtype),
        "b2": fc2_b.reshape(1, D).astype(jnp.float32),
    }


def clip_mlp(x, params, *, tm=256):
    """CLIPMLP forward: fc2(quick_gelu(fc1(x)))."""
    w1, b1, w2, b2 = params["w1"], params["b1"], params["w2"], params["b2"]
    orig_shape = x.shape
    D = orig_shape[-1]
    I = w1.shape[1]
    assert w1.shape == (D, I) and w2.shape == (I, D)

    x2 = x.reshape(-1, D)
    M = x2.shape[0]

    # Row-tile selection: weights are VMEM-resident, so tm only affects grid
    # step overhead -- keep it large.  For small inputs, shrink tm so there are
    # still >= 2 row tiles (keeps v7x's second TensorCore busy).
    if M <= tm:
        tm = max(8, _round_up(max(M // 2, 1), 8))
    M_pad = _round_up(M, tm)
    if M_pad != M:
        x2 = jnp.pad(x2, ((0, M_pad - M), (0, 0)))
    grid = (M_pad // tm,)

    out_dtype = x.dtype
    out_itemsize = jnp.dtype(out_dtype).itemsize
    x_itemsize = jnp.dtype(x.dtype).itemsize
    w_bytes = w1.size * w1.dtype.itemsize + w2.size * w2.dtype.itemsize
    b_bytes = (b1.size + b2.size) * 4

    # Advisory cost estimate: two matmuls, sigmoid ~ exp + reciprocal, weights
    # read exactly once (resident), x read + out written once.
    cost = pl.CostEstimate(
        flops=4 * M_pad * D * I,
        transcendentals=2 * M_pad * I,
        bytes_accessed=M_pad * D * (x_itemsize + out_itemsize) + w_bytes + b_bytes,
    )

    # Explicit VMEM budget: single-buffered resident weights + double-buffered
    # x/out tiles + (tm, I) f32 intermediates; clamp to v7x's 64 MiB physical.
    vmem_need = (w_bytes + b_bytes
                 + 2 * tm * D * (x_itemsize + out_itemsize)
                 + 2 * tm * I * 4
                 + tm * D * 4)
    vmem_limit = int(min(max(vmem_need * 3 // 2, 32 << 20), 64 << 20))
    # TODO(synk): for very large models (w1+w2 > ~40 MiB bf16) add an I-tiled
    # accumulator fallback instead of fully VMEM-resident weights.

    out = pl.pallas_call(
        _clip_mlp_kernel,
        grid_spec=pltpu.PrefetchScalarGridSpec(
            num_scalar_prefetch=0,
            grid=grid,
            in_specs=[
                pl.BlockSpec((tm, D), lambda m: (m, 0)),          # x row tile
                pl.BlockSpec((D, I), lambda m: (0, 0),            # fc1 W: resident
                             pipeline_mode=pl.Buffered(1)),
                pl.BlockSpec((1, I), lambda m: (0, 0)),           # fc1 bias
                pl.BlockSpec((I, D), lambda m: (0, 0),            # fc2 W: resident
                             pipeline_mode=pl.Buffered(1)),
                pl.BlockSpec((1, D), lambda m: (0, 0)),           # fc2 bias
            ],
            out_specs=pl.BlockSpec((tm, D), lambda m: (m, 0)),
        ),
        out_shape=jax.ShapeDtypeStruct((M_pad, D), out_dtype),
        compiler_params=pltpu.CompilerParams(
            dimension_semantics=("parallel",),
            vmem_limit_bytes=vmem_limit,
        ),
        cost_estimate=cost,
    )(x2, w1, b1, w2, b2)

    return out[:M].reshape(orig_shape)


# ---------------------------------- main ------------------------------------

if __name__ == "__main__":
    # Small shapes consistent with the module: batch=2, seq=8, hidden=32,
    # intermediate=4*hidden=128 (CLIP uses a 4x MLP expansion).
    B, S, D, I = 2, 8, 32, 128

    key = jax.random.PRNGKey(0)
    kx, k1, k2, k3, k4 = jax.random.split(key, 5)

    x = jax.random.normal(kx, (B, S, D), jnp.float32)
    fc1_w = jax.random.normal(k1, (D, I), jnp.float32) * 0.02
    fc1_b = jax.random.normal(k2, (I,), jnp.float32) * 0.02
    fc2_w = jax.random.normal(k3, (I, D), jnp.float32) * 0.02
    fc2_b = jax.random.normal(k4, (D,), jnp.float32) * 0.02

    # One-time parameter prep (bf16 weights, f32 row-vector biases).
    params = prepare_clip_mlp_params(fc1_w, fc1_b, fc2_w, fc2_b)

    fwd = jax.jit(clip_mlp)
    out = fwd(x, params)
    jax.block_until_ready(out)

    # Pure-JAX f32 reference of the PyTorch forward.
    h_ref = x @ fc1_w + fc1_b
    h_ref = h_ref * jax.nn.sigmoid(1.702 * h_ref)
    ref = h_ref @ fc2_w + fc2_b

    assert out.shape == (B, S, D), out.shape
    assert bool(jnp.all(jnp.isfinite(out)))
    max_err = float(jnp.max(jnp.abs(out - ref)))
    assert jnp.allclose(out, ref, atol=1e-2, rtol=5e-2), max_err
    print("KERNEL_OK")
</pallas_src>

<mosaic_0001>
module attributes {stable_mosaic.version = 11 : i64} {
  func.func @_clip_mlp_kernel(%arg0: i32, %arg1: memref<8x32xf32, #tpu.memory_space<vmem>>, %arg2: memref<32x128xbf16, #tpu.memory_space<vmem>>, %arg3: memref<1x128xf32, #tpu.memory_space<vmem>>, %arg4: memref<128x32xbf16, #tpu.memory_space<vmem>>, %arg5: memref<1x32xf32, #tpu.memory_space<vmem>>, %arg6: memref<8x32xf32, #tpu.memory_space<vmem>>) attributes {dimension_semantics = [#tpu.dimension_semantics<parallel>], iteration_bounds = array<i64: 2>, scalar_prefetch = 0 : i64, scratch_operands = 0 : i64, tpu.core_type = #tpu.core_type<tc>, window_params = [{transform_indices = @transform_0, window_bounds = array<i64: 8, 32>}, {pipeline_mode = #tpu.pipeline_mode<synchronous>, transform_indices = @transform_1, window_bounds = array<i64: 32, 128>}, {pipeline_mode = #tpu.pipeline_mode<synchronous>, transform_indices = @transform_2, window_bounds = array<i64: 1, 128>}, {pipeline_mode = #tpu.pipeline_mode<synchronous>, transform_indices = @transform_3, window_bounds = array<i64: 128, 32>}, {pipeline_mode = #tpu.pipeline_mode<synchronous>, transform_indices = @transform_4, window_bounds = array<i64: 1, 32>}, {transform_indices = @transform_5, window_bounds = array<i64: 8, 32>}]} {
    %c0 = arith.constant 0 : index
    %c0_0 = arith.constant 0 : index
    %0 = vector.load %arg1[%c0, %c0_0] : memref<8x32xf32, #tpu.memory_space<vmem>>, vector<8x32xf32>
    %1 = arith.truncf %0 : vector<8x32xf32> to vector<8x32xbf16>
    %c0_1 = arith.constant 0 : index
    %c0_2 = arith.constant 0 : index
    %2 = vector.load %arg2[%c0_1, %c0_2] : memref<32x128xbf16, #tpu.memory_space<vmem>>, vector<32x128xbf16>
    %cst = arith.constant dense<0.000000e+00> : vector<8x128xf32>
    %3 = tpu.matmul %1, %2, %cst {dimension_numbers = #tpu.dot_dimension_numbers<[1], [0], [0], [1], [0, 0, 1, 1], [], []>} : vector<8x32xbf16>, vector<32x128xbf16>, vector<8x128xf32> -> vector<8x128xf32>
    %c0_3 = arith.constant 0 : index
    %c0_4 = arith.constant 0 : index
    %4 = vector.load %arg3[%c0_3, %c0_4] : memref<1x128xf32, #tpu.memory_space<vmem>>, vector<1x128xf32>
    %5 = vector.broadcast %4 : vector<1x128xf32> to vector<8x128xf32>
    %6 = arith.addf %3, %5 : vector<8x128xf32>
    %cst_5 = arith.constant 1.702000e+00 : f32
    %7 = vector.broadcast %cst_5 : f32 to vector<8x128xf32>
    %8 = arith.mulf %7, %6 : vector<8x128xf32>
    %9 = arith.negf %8 : vector<8x128xf32>
    %10 = math.exp %9 : vector<8x128xf32>
    %cst_6 = arith.constant 1.000000e+00 : f32
    %11 = vector.broadcast %cst_6 : f32 to vector<8x128xf32>
    %12 = arith.addf %11, %10 : vector<8x128xf32>
    %13 = arith.divf %11, %12 : vector<8x128xf32>
    %14 = arith.mulf %6, %13 : vector<8x128xf32>
    %15 = arith.truncf %14 : vector<8x128xf32> to vector<8x128xbf16>
    %c0_7 = arith.constant 0 : index
    %c0_8 = arith.constant 0 : index
    %16 = vector.load %arg4[%c0_7, %c0_8] : memref<128x32xbf16, #tpu.memory_space<vmem>>, vector<128x32xbf16>
    %cst_9 = arith.constant dense<0.000000e+00> : vector<8x32xf32>
    %17 = tpu.matmul %15, %16, %cst_9 {dimension_numbers = #tpu.dot_dimension_numbers<[1], [0], [0], [1], [0, 0, 1, 1], [], []>} : vector<8x128xbf16>, vector<128x32xbf16>, vector<8x32xf32> -> vector<8x32xf32>
    %c0_10 = arith.constant 0 : index
    %c0_11 = arith.constant 0 : index
    %18 = vector.load %arg5[%c0_10, %c0_11] : memref<1x32xf32, #tpu.memory_space<vmem>>, vector<1x32xf32>
    %19 = vector.broadcast %18 : vector<1x32xf32> to vector<8x32xf32>
    %20 = arith.addf %17, %19 : vector<8x32xf32>
    %c0_12 = arith.constant 0 : index
    %c0_13 = arith.constant 0 : index
    %21 = vector.load %arg6[%c0_12, %c0_13] : memref<8x32xf32, #tpu.memory_space<vmem>>, vector<8x32xf32>
    tpu.vector_store %arg6[%c0_12, %c0_13], %20 {strides = array<i32>} : memref<8x32xf32, #tpu.memory_space<vmem>>, vector<8x32xf32>,
    return
  }
  func.func @transform_0(%arg0: i32) -> (i32, i32) {
    %c0_i32 = arith.constant 0 : i32
    %c0_i32_0 = arith.constant 0 : i32
    return %arg0, %c0_i32 : i32, i32
  }
  func.func @transform_1(%arg0: i32) -> (i32, i32) {
    %c0_i32 = arith.constant 0 : i32
    %c0_i32_0 = arith.constant 0 : i32
    %c0_i32_1 = arith.constant 0 : i32
    return %c0_i32, %c0_i32_0 : i32, i32
  }
  func.func @transform_2(%arg0: i32) -> (i32, i32) {
    %c0_i32 = arith.constant 0 : i32
    %c0_i32_0 = arith.constant 0 : i32
    %c0_i32_1 = arith.constant 0 : i32
    return %c0_i32, %c0_i32_0 : i32, i32
  }
  func.func @transform_3(%arg0: i32) -> (i32, i32) {
    %c0_i32 = arith.constant 0 : i32
    %c0_i32_0 = arith.constant 0 : i32
    %c0_i32_1 = arith.constant 0 : i32
    return %c0_i32, %c0_i32_0 : i32, i32
  }
  func.func @transform_4(%arg0: i32) -> (i32, i32) {
    %c0_i32 = arith.constant 0 : i32
    %c0_i32_0 = arith.constant 0 : i32
    %c0_i32_1 = arith.constant 0 : i32
    return %c0_i32, %c0_i32_0 : i32, i32
  }
  func.func @transform_5(%arg0: i32) -> (i32, i32) {
    %c0_i32 = arith.constant 0 : i32
    %c0_i32_0 = arith.constant 0 : i32
    return %arg0, %c0_i32 : i32, i32
  }
}

</mosaic_0001>

<bundles_post_ra>
// kernel: clip_mlp.1
= control target key start
LH: loop header
LB: loop body
LE: loop exit
PB: predicated region body
PF: predicated region fallthrough
CT: control target
= control target key end

     0   :  { %10 = vsyncpa [#allocation3], 0  ;;  %s763_s0 = inlined_call_operand.vmem [shape: f32[16,32], index: 0, kind: input, shape index: {}]   ;;  %s764_s1 = inlined_call_operand.vmem [shape: bf16[32,128], index: 1, kind: input, shape index: {}]   ;;  %s765_s2 = inlined_call_operand.vmem [shape: f32[1,128], index: 2, kind: input, shape index: {}]   ;;  %s766_s3 = inlined_call_operand.vmem [shape: bf16[128,32], index: 3, kind: input, shape index: {}]   ;;  %s767_s4 = inlined_call_operand.vmem [shape: f32[1,32], index: 4, kind: input, shape index: {}]   ;;  %s768_s5 = inlined_call_operand.hbm [shape: f32[16,32], index: 5, kind: output, shape index: {}]  }
   0x1   :  { %12 = vsyncpa [#allocation3 + $0x1], 0  ;;  %s640_s18 = smov 0   ;;  %s642_s19 = smov 0  }
   0x2   :  { %s644_s20 = smov 0   ;;  %s646_s21 = smov 0  }
   0x3 LB: > { %s661_s22 = sadd.s32 4294967295, %s608_s21   ;;  %s439_s23 = sadd.s32 4294967294, %s608_s21   ;;  %s608_s21 = sphi %s646_s21, %s774_s21   ;;  %s604_s20 = sphi %s644_s20, %s773_s20   ;;  %s600_s19 = sphi %s642_s19, %s772_s19   ;;  %s596_s18 = sphi %s640_s18, %s771_s18  }
   0x4   : > { %s665_s24 = sadd.s32 1, %s608_s21   ;;  %s135_s25 = sadd.s32 1, %s604_s20 }
   0x5   : > { %s132_s26 = ssub.s32 %s608_s21, %s665_s24  ;;  %p145_p0 = scmp.ne.s32.totalorder %s604_s20, %s600_s19 }
   0x6   : > { %p133_p1 = scmp.eq.s32.totalorder %s132_s26, 0  ;;  %p146_p2 = scmp.eq.s32.totalorder %s661_s22, 1 }
   0x7   : > { %p151_p3 = scmp.ne.s32.totalorder %s600_s19, %s596_s18  ;;  %p152_p4 = scmp.eq.s32.totalorder %s439_s23, 1 }
   0x8   : > { %s676_s27 = scalar_select %p133_p1, %s604_s20, %s135_s25  }
   0x9   : > { %p678_p5 = por %p146_p2, %p145_p0  ;;  %p682_p6 = por %p152_p4, %p151_p3 }
   0xa   : > { %p442_p7 = scmp.ge.s32.totalorder %s608_s21, 1  ;;  %p189_p8 = scmp.lt.s32.totalorder %s608_s21, 3 }
   0xc   : > { %p190_p9 = pnand %p442_p7, %p189_p8 }
   0xd   : > { %p216_p10 = scmp.lt.s32.totalorder (!%p190_p9), %s661_s22, 1  ;;  %s213_s16 = sand.u32 (!%p190_p9), 1, %s600_s19  }
   0xe   : > { %193 = sbr.rel (%p190_p9) target bundleno = 323 (0x143), region = 40  ;;  %s488_s17 = sshll.u32 (!%p190_p9), %s661_s22, 3 }
   0xf   : > { %s443_s23 = sshll.u32 (!%p190_p9), %s213_s16, 3  ;;  %s375_s30 = scalar_lea.hbm (!%p190_p9), %s768_s5, %s488_s17 }
  0x10   : > { %s215_s8 = scalar_lea.vmem (!%p190_p9), [#allocation2], %s443_s23  ;;  %s566_s15 = scalar_lea.hbm (!%p190_p9), %s768_s5, 16 }
  0x13   : > { %v492_v0 = vld [vmem:[%s764_s1 + $0x8] sm:$0xff]  ;;  %v491_v1 = vld [vmem:[%s764_s1] sm:$0xff]  ;;  %s217_s9 = scalar_select %p216_p10, %s661_s22, 1  ;;  %vm243_vm0 = vcmask 261120   ;;  %v500_v4 = vld [vmem:[%s766_s3 + $0x38] sm:$0xff] }
  0x14   : > { %253 = vmatpush.bf16.msra.mxu0 %v492_v0  ;;  %350 = vmatpush.bf16.msra.mxu1 %v500_v4  ;;  %v499_v5 = vld [vmem:[%s766_s3 + $0x30] sm:$0xff]  ;;  %v498_v6 = vld [vmem:[%s766_s3 + $0x28] sm:$0xff]  ;;  %v497_v7 = vld [vmem:[%s766_s3 + $0x20] sm:$0xff]  ;;  %s365_s22 = scalar_lea.sflag [#allocation3], %s213_s16 }
  0x15   : > { %s444_s10 = sshll.u32 %s217_s9, 3  ;;  %v496_v8 = vld [vmem:[%s766_s3 + $0x18] sm:$0xff]  ;;  %v495_v9 = vld [vmem:[%s766_s3 + $0x10] sm:$0xff]  ;;  %v494_v10 = vld [vmem:[%s766_s3 + $0x8] sm:$0xff]  ;;  %s377_s9 = sshll.u32 %s215_s8, 4  ;;  %s378_s9 = int_to_ptr.vmem [resolvable:$true] %s377_s9 }
  0x16   : > { %s219_s13 = scalar_lea.vmem %s763_s0, %s444_s10  ;;  %v540_v11 = vld [vmem:[%s765_s2] ss:$0 sm:$0xff]  ;;  %s379_s10 = sshll.u32 %s375_s30, 4  ;;  %s380_s10 = int_to_ptr.hbm [resolvable:$true] %s379_s10 }
  0x17   : > { %v221_v2 = vld [vmem:[%s219_s13] sm:$0xff]  ;;  %s560_s11 = sshra.s32 %s380_s10, 4  ;;  %s561_s11 = int_to_ptr.hbm [resolvable:$true] %s560_s11 }
  0x18   : > { %254 = vmatpush.bf16.msra.mxu0 %v491_v1  ;;  %v222_v3 = vpack.c.bf16 %v221_v2, %v221_v2  ;;  %351 = vmatpush.bf16.msra.mxu1 %v499_v5  ;;  %v493_v12 = vld [vmem:[%s766_s3] sm:$0xff]  ;;  %s562_s12 = scalar_lea.hbm %s561_s11, 8  ;;  %p567_p0 = scmp.lt.s32.totalorder %s561_s11, %s768_s5 }
  0x19   : > { %v541_v32 = vld [vmem:[%s767_s4] ss:$0 sm:$0xff]  ;;  %p563_p11 = scmp.ne.s32.totalorder %s561_s11, %s562_s12  ;;  %p568_p1 = scmp.lt.s32.totalorder %s566_s15, %s562_s12 }
  0x1b   : > { %453 = vmatmul.msk.bf16.vlgmr.msra.gmra.mxu0 %vm243_vm0, %v222_v3  ;;  %p564_p12 = pnand %p563_p11, %p678_p5  ;;  %p569_p2 = por %p568_p1, %p567_p0 }
  0x1c   : > { %352 = vmatpush.bf16.msra.mxu1 %v498_v6 }
  0x1d   : > { %p565_p13 = pneg %p564_p12 }
  0x1f   : > { %p570_p3 = pnand %p569_p2, %p565_p13 }
  0x20   : > { %353 = vmatpush.bf16.msra.mxu1 %v497_v7 }
  0x24   : > { %354 = vmatpush.bf16.msra.mxu1 %v496_v8 }
  0x28   : > { %355 = vmatpush.bf16.msra.mxu1 %v495_v9 }
  0x2c   : > { %356 = vmatpush.bf16.msra.mxu1 %v494_v10 }
  0x30   : > { %357 = vmatpush.bf16.msra.mxu1 %v493_v12 }
  0x98   : > { %v256_v13 = vpop.f32.mrf.mxu0 }
  0x99   : > { %v257_v14 = vadd.f32 %v540_v11, %v256_v13 }
  0x9b   : > { %v454_v15 = vmul.f32 -1.702, %v257_v14 }
  0x9d   : > { %v262_v16 = vmul.f32 1.442695, %v454_v15 }
  0x9f   : > { %542 = vpow2.f32 %v262_v16 }
  0xa0   : > { %v258_v17 = vpop.f32.mrf.mxu0 }
  0xa5   : > { %v543_v18 = vpop.eup %542 }
  0xa6   : > { %v264_v19 = vadd.f32 1.0, %v543_v18 }
  0xa8   : > { %544 = vrcp.f32 %v264_v19  ;;  %v276_v23 = vand.u32 2147483648, %v264_v19  ;;  %v274_v25 = vand.u32 2147483647, %v264_v19  ;;  %vm270_vm2 = vweird.f32 %v264_v19 }
  0xaa   : > { %v277_v27 = vor.u32 1.1754944e-38, %v276_v23  ;;  %vm275_vm4 = vcmp.eq.f32.partialorder %v274_v25, 8.507059e+37 }
  0xae   : > { %v545_v20 = vpop.eup %544 }
  0xaf   : > { %v266_v21 = vmul.f32 %v545_v20, %v264_v19  ;;  %vm271_vm1 = vweird.f32 %v545_v20 }
  0xb0   : > { %vm272_vm3 = vmor %vm270_vm2, %vm271_vm1 }
  0xb1   : > { %v267_v22 = vsub.f32 1.0, %v266_v21 }
  0xb3   : > { %v268_v24 = vmul.f32 %v545_v20, %v267_v22 }
  0xb5   : > { %v269_v26 = vadd.f32 %v545_v20, %v268_v24 }
  0xb7   : > { %v273_v28 = vsel %vm272_vm3, %v545_v20, %v269_v26 }
  0xb8   : > { %v278_v29 = vsel %vm275_vm4, %v277_v27, %v273_v28 }
  0xb9   : > { %v280_v30 = vmul.f32 %v278_v29, %v257_v14 }
  0xbb   : > { %v281_v31 = vpack.c.bf16 %v280_v30, %v280_v30 }
  0xbd   : > { %358 = vmatmul.bf16.vlgmr.msra.gmra.mxu1 %v281_v31 }
 0x13a   : > { %v359_v33 = vpop.f32.mrf.mxu1 }
 0x13b   : > { %v360_v34 = vadd.f32 %v541_v32, %v359_v33 }
 0x13d   : > { %363 = vst.msk [vmem:[%s215_s8] sm:$0xff] %vm243_vm0, %v360_v34 }
 0x13e   : > { %573 = shalt.err (!%p570_p3)
}
 0x13f   : > { %501 = dma.vmem_to_hbm [thread:$0]  (%p678_p5), %s378_s9, 128, %s380_s10, %s365_s22  }
 0x142   : > { %v361_v35 = vpop.f32.mrf.mxu1 }
 0x143 PF: > { %p507_p4 = scmp.ge.s32.totalorder %s608_s21, 2  ;;  %s391_s16 = sand.u32 1, %s596_s18  }
 0x144   : > { %s392_s25 = scalar_lea.sflag [#allocation3], %s391_s16 }
 0x145   : > { %p504_p7 = pnand %p507_p4, %p682_p6 }
 0x147   : > { %p505_p8 = pneg %p504_p7 }
 0x149   : > { %591 = dma.done.wait (%p505_p8), %s392_s25, 128  }
 0x14a   : > { %593 = vsyncadd (%p505_p8), %s392_s25, 4294967168  ;;  %p15_p9 = scmp.ge.s32.totalorder %s665_s24, 4   ;;  %s771_s18 = smov %s600_s19 }
 0x14b   : > { %s772_s19 = smov %s604_s20  ;;  %s773_s20 = smov %s676_s27 }
 0x14c   : > { %s774_s21 = smov %s665_s24  ;;  %17 = sbr.rel (!%p15_p9) target bundleno = 3 (0x3), region = 75 }
 0x151   :  { %398 = vsyncpa [#allocation3], 1 }
 0x152   :  { %400 = vsyncpa [#allocation3 + $0x1], 1 }

</bundles_post_ra>
